<compile_context>
chip_gen: v7x
topology: tpu7x:2x2x1
jax: 0.10.0
libtpu: 0.0.40
codegen_flags: <defaults>
</compile_context>

<pallas_src>
import functools

import jax
import jax.numpy as jnp
from jax.experimental import pallas as pl
from jax.experimental.pallas import tpu as pltpu

BN_EPS = 1e-5
LANE = 128


def _round_up(x, m):
    return ((x + m - 1) // m) * m


def _critic_kernel(x_ref, w1c_ref, w2c_ref, rowp_ref, q_ref, *, kpad, f2p):
    """One batch tile of the fused critic forward.

    x_ref:    (TM, S+A)   f32  concat(state, action) rows
    w1c_ref:  (S+A, kpad) bf16 BN-folded fc1 weight in cols [0,f1) + identity
                               pass-through of the action in cols [f1,f1+A); zero pad
    w2c_ref:  (kpad, f2p) bf16 fc2 weight over the "concatenated" hidden; zero pad
    rowp_ref: (8, padw)   f32  row0: folded fc1 bias (zero on action/pad lanes)
                               row1: pass-through gate (1.0 on action lanes, else 0.0)
                               row2: fc2 bias, row3: fc3 weight row, row4: [fc3 bias,0..]
    """
    x = x_ref[...]                                  # (TM, S+A) f32

    b1 = rowp_ref[0:1, :kpad]                       # (1, kpad)
    gate = rowp_ref[1:2, :kpad]                     # (1, kpad)
    b2 = rowp_ref[2:3, :f2p]                        # (1, f2p)
    w3 = rowp_ref[3:4, :f2p]                        # (1, f2p)
    b3 = rowp_ref[4:5, 0:1]                         # (1, 1)

    # Stage 1 (MXU, bf16 operands, f32 accumulate): BN-folded fc1 + action pass-through.
    h = jnp.dot(x.astype(jnp.bfloat16), w1c_ref[...],
                preferred_element_type=jnp.float32) + b1
    # Masked ReLU: ReLU on fc1 lanes (gate==0), identity on action lanes (gate==1).
    # Padded lanes are exactly 0 either way (zero weight columns + zero bias).
    h = jnp.maximum(h, h * gate)                    # (TM, kpad)

    # Stage 2 (MXU): fc2 over the already-"concatenated" h — one K=kpad matmul.
    h2 = jnp.dot(h.astype(jnp.bfloat16), w2c_ref[...],
                 preferred_element_type=jnp.float32) + b2
    h2 = jnp.maximum(h2, 0.0)                       # (TM, f2p); padded lanes stay 0

    # Stage 3: fc3 (out_features == 1) as VPU multiply + XLU lane reduction.
    # TODO(synk): output is written as a (TM, 1) column (masked stores); a lane-dense
    # (1, TM) layout would need a sublane<->lane relayout that is not guaranteed to
    # lower for degenerate shapes, so it is intentionally not used here.
    q = jnp.sum(h2 * w3, axis=-1, keepdims=True) + b3
    q_ref[...] = q.astype(q_ref.dtype)


def critic_forward(state, action, kp, *, block_rows=2048):
    """Fused critic forward.  state (B,S), action (B,A) float32 -> (B,1) Q-values."""
    B = state.shape[0]
    x = jnp.concatenate([state, action], axis=1).astype(jnp.float32)   # (B, S+A)
    SA = x.shape[1]
    kpad = kp["w1c"].shape[1]
    f2p = kp["w2c"].shape[1]
    padw = kp["rowp"].shape[1]

    # Batch tile: as large as block_rows (per-grid-step overhead dominates small
    # tiles), a multiple of 8, and at most ceil(B/2) so non-tiny batches use >= 2
    # grid steps (both TensorCores on v7x).  Pad B so every step is a full tile.
    tm = min(block_rows, _round_up(max((B + 1) // 2, 1), 8))
    grid_m = _round_up(B, tm) // tm
    Bp = grid_m * tm
    if Bp != B:
        x = jnp.pad(x, ((0, Bp - B), (0, 0)))       # zero rows; sliced off below

    kernel = functools.partial(_critic_kernel, kpad=kpad, f2p=f2p)

    q = pl.pallas_call(
        kernel,
        out_shape=jax.ShapeDtypeStruct((Bp, 1), jnp.float32),
        grid_spec=pltpu.PrefetchScalarGridSpec(
            num_scalar_prefetch=0,
            grid=(grid_m,),
            in_specs=[
                pl.BlockSpec((tm, SA), lambda i: (i, 0)),     # concat(state, action) tile
                pl.BlockSpec((SA, kpad), lambda i: (0, 0)),   # combined fc1 weight (resident)
                pl.BlockSpec((kpad, f2p), lambda i: (0, 0)),  # combined fc2 weight (resident)
                pl.BlockSpec((8, padw), lambda i: (0, 0)),    # packed biases / gate / fc3 row
            ],
            out_specs=pl.BlockSpec((tm, 1), lambda i: (i, 0)),
        ),
        compiler_params=pltpu.CompilerParams(
            dimension_semantics=("parallel",)),
    )(x, kp["w1c"], kp["w2c"], kp["rowp"])
    return q[:B]


def init_raw_params(key, state_size, action_size, fc1_units, fc2_units):
    """PyTorch-equivalent Critic parameters ('uniform' weight_init, batchnorm=True,
    PyTorch-default bias init, eval-mode BN running stats)."""
    ks = jax.random.split(key, 12)
    f32 = jnp.float32

    def uniform(k, shape, lim):
        return jax.random.uniform(k, shape, f32, -lim, lim)

    # hidden_init(layer) in the reference uses weight.size()[0] == out_features.
    w1 = uniform(ks[0], (fc1_units, state_size), 1.0 / float(fc1_units) ** 0.5)
    b1 = uniform(ks[1], (fc1_units,), 1.0 / float(state_size) ** 0.5)
    w2 = uniform(ks[2], (fc2_units, fc1_units + action_size), 1.0 / float(fc2_units) ** 0.5)
    b2 = uniform(ks[3], (fc2_units,), 1.0 / float(fc1_units + action_size) ** 0.5)
    w3 = uniform(ks[4], (1, fc2_units), 3e-3)
    b3 = uniform(ks[5], (1,), 1.0 / float(fc2_units) ** 0.5)

    bn0_gamma = 1.0 + 0.1 * jax.random.normal(ks[6], (state_size,), f32)
    bn0_beta = 0.1 * jax.random.normal(ks[7], (state_size,), f32)
    bn0_mean = 0.05 * jax.random.normal(ks[8], (state_size,), f32)
    bn0_var = jnp.abs(1.0 + 0.1 * jax.random.normal(ks[9], (state_size,), f32))
    bn1_gamma = jnp.ones((fc1_units,), f32)
    bn1_beta = jnp.zeros((fc1_units,), f32)
    bn1_mean = 0.05 * jax.random.normal(ks[10], (fc1_units,), f32)
    bn1_var = jnp.abs(1.0 + 0.1 * jax.random.normal(ks[11], (fc1_units,), f32))

    return dict(w1=w1, b1=b1, w2=w2, b2=b2, w3=w3, b3=b3,
                bn0_gamma=bn0_gamma, bn0_beta=bn0_beta, bn0_mean=bn0_mean, bn0_var=bn0_var,
                bn1_gamma=bn1_gamma, bn1_beta=bn1_beta, bn1_mean=bn1_mean, bn1_var=bn1_var)


def fold_params(rp, state_size, action_size):
    """One-time wrapper-side precompute.

    Folds eval-mode BN0/BN1 into fc1, absorbs the concat(h1, action) into the matmul
    structure (identity pass-through columns for the action + a per-lane ReLU gate),
    zero-pads feature dims to the 128-lane width, casts MXU weights to bf16, and packs
    all row parameters into one (8, padw) f32 array.

    NOTE: the zero padding (w1c/w2c pad columns & rows, b1/gate/b2/w3 pad lanes) is a
    correctness invariant: it keeps the padded lanes of h and h2 exactly 0 inside the
    kernel.  Do not change it without changing the kernel.
    """
    S, A = state_size, action_size
    f1 = rp["w1"].shape[0]
    f2 = rp["w2"].shape[0]
    kpad = _round_up(f1 + A, LANE)
    f2p = _round_up(f2, LANE)
    padw = max(kpad, f2p)
    assert f1 + A <= kpad and f2 <= f2p

    s0 = rp["bn0_gamma"] * jax.lax.rsqrt(rp["bn0_var"] + BN_EPS)      # (S,)
    c0 = rp["bn0_beta"] - rp["bn0_mean"] * s0
    s1 = rp["bn1_gamma"] * jax.lax.rsqrt(rp["bn1_var"] + BN_EPS)      # (f1,)
    c1 = rp["bn1_beta"] - rp["bn1_mean"] * s1

    # BN1(fc1(BN0(x))) == x @ w1f + b1f  (pre-ReLU)
    w1t = rp["w1"].T                                                   # (S, f1)
    w1f = (s0[:, None] * w1t) * s1[None, :]
    b1f = (c0 @ w1t + rp["b1"]) * s1 + c1

    # Combined first-stage weight: fc1 in lanes [0,f1), action identity in [f1,f1+A).
    w1c = jnp.zeros((S + A, kpad), jnp.float32)
    w1c = w1c.at[:S, :f1].set(w1f)
    w1c = w1c.at[S:, f1:f1 + A].set(jnp.eye(A, dtype=jnp.float32))

    # Combined fc2 weight over the "concatenated" hidden (K = kpad).
    w2c = jnp.zeros((kpad, f2p), jnp.float32)
    w2c = w2c.at[:f1, :f2].set(rp["w2"][:, :f1].T)
    w2c = w2c.at[f1:f1 + A, :f2].set(rp["w2"][:, f1:].T)

    gate = jnp.zeros((kpad,), jnp.float32).at[f1:f1 + A].set(1.0)

    rowp = jnp.zeros((8, padw), jnp.float32)
    rowp = rowp.at[0, :f1].set(b1f)            # folded fc1 bias (zero elsewhere)
    rowp = rowp.at[1, :kpad].set(gate)         # ReLU pass-through gate
    rowp = rowp.at[2, :f2].set(rp["b2"])       # fc2 bias
    rowp = rowp.at[3, :f2].set(rp["w3"][0])    # fc3 weight row
    rowp = rowp.at[4, 0].set(rp["b3"][0])      # fc3 bias

    return {
        "w1c": w1c.astype(jnp.bfloat16),
        "w2c": w2c.astype(jnp.bfloat16),
        "rowp": rowp,
    }


def critic_reference(state, action, rp):
    """Pure-JAX f32 reference matching the PyTorch forward (eval-mode BN, explicit concat)."""
    xs = (state - rp["bn0_mean"]) / jnp.sqrt(rp["bn0_var"] + BN_EPS) * rp["bn0_gamma"] + rp["bn0_beta"]
    h1 = xs @ rp["w1"].T + rp["b1"]
    h1 = (h1 - rp["bn1_mean"]) / jnp.sqrt(rp["bn1_var"] + BN_EPS) * rp["bn1_gamma"] + rp["bn1_beta"]
    h1 = jax.nn.relu(h1)
    x = jnp.concatenate([h1, action], axis=1)
    h2 = jax.nn.relu(x @ rp["w2"].T + rp["b2"])
    return h2 @ rp["w3"].T + rp["b3"]


if __name__ == "__main__":
    # Small, module-consistent shapes.
    batch, state_size, action_size = 8, 32, 8
    fc1_units, fc2_units = 64, 32

    key = jax.random.PRNGKey(0)
    k_state, k_action, k_params, k_s2, k_a2 = jax.random.split(key, 5)
    state = jax.random.normal(k_state, (batch, state_size), jnp.float32)
    action = jax.random.normal(k_action, (batch, action_size), jnp.float32)

    raw = init_raw_params(k_params, state_size, action_size, fc1_units, fc2_units)
    kp = fold_params(raw, state_size, action_size)

    # TODO(synk): training-mode BatchNorm (batch statistics + running-stat update) is not
    # implemented; the kernel covers eval-mode inference (running stats folded into fc1).
    q = critic_forward(state, action, kp)
    q = jax.block_until_ready(q)

    q_ref = critic_reference(state, action, raw)
    assert q.shape == (batch, 1)
    # bf16 MXU operands (f32 accumulation / bias / ReLU / fc3) -> loosened tolerance.
    assert jnp.allclose(q, q_ref, atol=2e-2, rtol=2e-2), "mismatch vs JAX reference"

    # Also exercise the multi-step grid + batch-padding path (grid of 2 tiles).
    batch2 = 300
    state2 = jax.random.normal(k_s2, (batch2, state_size), jnp.float32)
    action2 = jax.random.normal(k_a2, (batch2, action_size), jnp.float32)
    q2 = jax.block_until_ready(critic_forward(state2, action2, kp))
    q2_ref = critic_reference(state2, action2, raw)
    assert q2.shape == (batch2, 1)
    assert jnp.allclose(q2, q2_ref, atol=2e-2, rtol=2e-2), "mismatch vs JAX reference (tiled)"

    print("KERNEL_OK")
</pallas_src>

<mosaic_0001>
module attributes {stable_mosaic.version = 11 : i64} {
  func.func @_critic_kernel(%arg0: i32, %arg1: memref<8x40xf32, #tpu.memory_space<vmem>>, %arg2: memref<40x128xbf16, #tpu.memory_space<vmem>>, %arg3: memref<128x128xbf16, #tpu.memory_space<vmem>>, %arg4: memref<8x128xf32, #tpu.memory_space<vmem>>, %arg5: memref<8x1xf32, #tpu.memory_space<vmem>>) attributes {dimension_semantics = [#tpu.dimension_semantics<parallel>], iteration_bounds = array<i64: 1>, scalar_prefetch = 0 : i64, scratch_operands = 0 : i64, tpu.core_type = #tpu.core_type<tc>, window_params = [{transform_indices = @transform_0, window_bounds = array<i64: 8, 40>}, {pipeline_mode = #tpu.pipeline_mode<synchronous>, transform_indices = @transform_1, window_bounds = array<i64: 40, 128>}, {pipeline_mode = #tpu.pipeline_mode<synchronous>, transform_indices = @transform_2, window_bounds = array<i64: 128, 128>}, {pipeline_mode = #tpu.pipeline_mode<synchronous>, transform_indices = @transform_3, window_bounds = array<i64: 8, 128>}, {transform_indices = @transform_4, window_bounds = array<i64: 8, 1>}]} {
    %c0 = arith.constant 0 : index
    %c0_0 = arith.constant 0 : index
    %0 = vector.load %arg1[%c0, %c0_0] : memref<8x40xf32, #tpu.memory_space<vmem>>, vector<8x40xf32>
    %c0_1 = arith.constant 0 : index
    %c0_2 = arith.constant 0 : index
    %1 = vector.load %arg4[%c0_1, %c0_2] : memref<8x128xf32, #tpu.memory_space<vmem>>, vector<1x128xf32>
    %c1 = arith.constant 1 : index
    %c0_3 = arith.constant 0 : index
    %2 = vector.load %arg4[%c1, %c0_3] : memref<8x128xf32, #tpu.memory_space<vmem>>, vector<1x128xf32>
    %c2 = arith.constant 2 : index
    %c0_4 = arith.constant 0 : index
    %3 = vector.load %arg4[%c2, %c0_4] : memref<8x128xf32, #tpu.memory_space<vmem>>, vector<1x128xf32>
    %c3 = arith.constant 3 : index
    %c0_5 = arith.constant 0 : index
    %4 = vector.load %arg4[%c3, %c0_5] : memref<8x128xf32, #tpu.memory_space<vmem>>, vector<1x128xf32>
    %c4 = arith.constant 4 : index
    %c0_6 = arith.constant 0 : index
    %5 = vector.load %arg4[%c4, %c0_6] : memref<8x128xf32, #tpu.memory_space<vmem>>, vector<1x1xf32>
    %6 = arith.truncf %0 : vector<8x40xf32> to vector<8x40xbf16>
    %c0_7 = arith.constant 0 : index
    %c0_8 = arith.constant 0 : index
    %7 = vector.load %arg2[%c0_7, %c0_8] : memref<40x128xbf16, #tpu.memory_space<vmem>>, vector<40x128xbf16>
    %cst = arith.constant dense<0.000000e+00> : vector<8x128xf32>
    %8 = tpu.matmul %6, %7, %cst {dimension_numbers = #tpu.dot_dimension_numbers<[1], [0], [0], [1], [0, 0, 1, 1], [], []>} : vector<8x40xbf16>, vector<40x128xbf16>, vector<8x128xf32> -> vector<8x128xf32>
    %9 = vector.broadcast %1 : vector<1x128xf32> to vector<8x128xf32>
    %10 = arith.addf %8, %9 : vector<8x128xf32>
    %11 = vector.broadcast %2 : vector<1x128xf32> to vector<8x128xf32>
    %12 = arith.mulf %10, %11 : vector<8x128xf32>
    %13 = arith.maximumf %10, %12 : vector<8x128xf32>
    %14 = arith.truncf %13 : vector<8x128xf32> to vector<8x128xbf16>
    %c0_9 = arith.constant 0 : index
    %c0_10 = arith.constant 0 : index
    %15 = vector.load %arg3[%c0_9, %c0_10] : memref<128x128xbf16, #tpu.memory_space<vmem>>, vector<128x128xbf16>
    %cst_11 = arith.constant dense<0.000000e+00> : vector<8x128xf32>
    %16 = tpu.matmul %14, %15, %cst_11 {dimension_numbers = #tpu.dot_dimension_numbers<[1], [0], [0], [1], [0, 0, 1, 1], [], []>} : vector<8x128xbf16>, vector<128x128xbf16>, vector<8x128xf32> -> vector<8x128xf32>
    %17 = vector.broadcast %3 : vector<1x128xf32> to vector<8x128xf32>
    %18 = arith.addf %16, %17 : vector<8x128xf32>
    %cst_12 = arith.constant 0.000000e+00 : f32
    %19 = vector.broadcast %cst_12 : f32 to vector<8x128xf32>
    %20 = arith.maximumf %18, %19 : vector<8x128xf32>
    %21 = vector.broadcast %4 : vector<1x128xf32> to vector<8x128xf32>
    %22 = arith.mulf %20, %21 : vector<8x128xf32>
    %cst_13 = arith.constant dense<0.000000e+00> : vector<8xf32>
    %23 = vector.multi_reduction <add>, %22, %cst_13 [1] : vector<8x128xf32> to vector<8xf32>
    %24 = vector.shape_cast %23 : vector<8xf32> to vector<8x1xf32>
    %25 = vector.broadcast %5 : vector<1x1xf32> to vector<8x1xf32>
    %26 = arith.addf %24, %25 : vector<8x1xf32>
    %c0_14 = arith.constant 0 : index
    %c0_15 = arith.constant 0 : index
    %27 = vector.load %arg5[%c0_14, %c0_15] : memref<8x1xf32, #tpu.memory_space<vmem>>, vector<8x1xf32>
    tpu.vector_store %arg5[%c0_14, %c0_15], %26 {strides = array<i32>} : memref<8x1xf32, #tpu.memory_space<vmem>>, vector<8x1xf32>,
    return
  }
  func.func @transform_0(%arg0: i32) -> (i32, i32) {
    %c0_i32 = arith.constant 0 : i32
    %c0_i32_0 = arith.constant 0 : i32
    return %arg0, %c0_i32 : i32, i32
  }
  func.func @transform_1(%arg0: i32) -> (i32, i32) {
    %c0_i32 = arith.constant 0 : i32
    %c0_i32_0 = arith.constant 0 : i32
    %c0_i32_1 = arith.constant 0 : i32
    return %c0_i32, %c0_i32_0 : i32, i32
  }
  func.func @transform_2(%arg0: i32) -> (i32, i32) {
    %c0_i32 = arith.constant 0 : i32
    %c0_i32_0 = arith.constant 0 : i32
    %c0_i32_1 = arith.constant 0 : i32
    return %c0_i32, %c0_i32_0 : i32, i32
  }
  func.func @transform_3(%arg0: i32) -> (i32, i32) {
    %c0_i32 = arith.constant 0 : i32
    %c0_i32_0 = arith.constant 0 : i32
    %c0_i32_1 = arith.constant 0 : i32
    return %c0_i32, %c0_i32_0 : i32, i32
  }
  func.func @transform_4(%arg0: i32) -> (i32, i32) {
    %c0_i32 = arith.constant 0 : i32
    %c0_i32_0 = arith.constant 0 : i32
    return %arg0, %c0_i32 : i32, i32
  }
}

</mosaic_0001>

<bundles_post_ra>
// kernel: tpu_custom_call.1
= control target key start
LH: loop header
LB: loop body
LE: loop exit
PB: predicated region body
PF: predicated region fallthrough
CT: control target
= control target key end

     0   :  { %9 = vsyncpa [#allocation3], 0  ;;  %s512_s0 = inlined_call_operand.hbm [shape: f32[8,40], index: 0, kind: input, shape index: {}]   ;;  %s513_s1 = inlined_call_operand.hbm [shape: bf16[40,128], index: 1, kind: input, shape index: {}]   ;;  %s514_s2 = inlined_call_operand.hbm [shape: bf16[128,128], index: 2, kind: input, shape index: {}]   ;;  %s515_s3 = inlined_call_operand.vmem [shape: f32[8,128], index: 3, kind: input, shape index: {}]   ;;  %s516_s4 = inlined_call_operand.vmem [shape: f32[8,1], index: 4, kind: output, shape index: {}]  }
   0x1   :  { %10 = vsyncpa [#allocation5], 0  ;;  %s420_s15 = smov [#allocation4]   ;;  %s350_s19 = scalar_lea.hbm %s513_s1, 320 }
   0x2   :  { %s26_s16 = sshll.u32 %s420_s15, 4  ;;  %p351_p0 = scmp.ne.s32.totalorder %s513_s1, %s350_s19  ;;  %s27_s16 = int_to_ptr.vmem [resolvable:$true] %s26_s16 }
   0x3   :  { %p354_p1 = scmp.lt.u32.totalorder %s350_s19, %s513_s1 }
   0x5   :  { %p356_p2 = pnand %p354_p1, %p351_p0 }
   0x7   :  { %359 = shalt.err (!%p356_p2)
}
   0x8   :  { %s360_s24 = scalar_lea.vmem %s27_s16, 320  ;;  %p365_p4 = scmp.lt.s32.totalorder %s27_s16, %s27_s16 }
   0x9   :  { %p361_p3 = scmp.ne.s32.totalorder %s27_s16, %s360_s24  ;;  %p366_p5 = scmp.lt.s32.totalorder %s360_s24, %s360_s24 }
   0xb   :  { %p367_p6 = por %p366_p5, %p365_p4 }
   0xd   :  { %p368_p7 = pnand %p367_p6, %p361_p3 }
   0xf   :  { %371 = shalt.err (!%p368_p7)
}
  0x10   :  { %s421_s25 = smov 64   ;;  %s422_s26 = smov 4  }
  0x11   :  { %32 = dma.hbm_to_vmem [thread:$0]  %s513_s1, 320, %s27_s16, [#allocation5], %s421_s25, %s421_s25, %s422_s26  }
  0x12   :  { %s423_s29 = smov [#allocation2]   ;;  %s424_s5 = smov [#allocation6]  }
  0x13   :  { %s17_s30 = sshll.u32 %s423_s29, 4  ;;  %s38_s6 = sshll.u32 %s424_s5, 4  ;;  %s18_s30 = int_to_ptr.vmem [resolvable:$true] %s17_s30  ;;  %s39_s6 = int_to_ptr.vmem [resolvable:$true] %s38_s6 }
  0x14   :  { %s372_s9 = scalar_lea.hbm %s512_s0, 128 }
  0x15   :  { %p373_p8 = scmp.ne.s32.totalorder %s512_s0, %s372_s9  ;;  %p376_p9 = scmp.lt.u32.totalorder %s372_s9, %s512_s0 }
  0x17   :  { %p378_p10 = pnand %p376_p9, %p373_p8 }
  0x19   :  { %381 = shalt.err (!%p378_p10)
}
  0x1a   :  { %s382_s1 = scalar_lea.vmem %s18_s30, 128  ;;  %p387_p12 = scmp.lt.s32.totalorder %s18_s30, %s18_s30 }
  0x1b   :  { %p383_p11 = scmp.ne.s32.totalorder %s18_s30, %s382_s1  ;;  %p388_p13 = scmp.lt.s32.totalorder %s382_s1, %s382_s1 }
  0x1d   :  { %p389_p0 = por %p388_p13, %p387_p12 }
  0x1f   :  { %p390_p1 = pnand %p389_p0, %p383_p11 }
  0x21   :  { %393 = shalt.err (!%p390_p1)
}
  0x22   :  { %20 = dma.hbm_to_vmem [thread:$0]  %s512_s0, 128, %s18_s30, [#allocation3]  }
  0x23   :  { %s394_s18 = scalar_lea.hbm %s514_s2, 1024 }
  0x24   :  { %p395_p2 = scmp.ne.s32.totalorder %s514_s2, %s394_s18  ;;  %p398_p3 = scmp.lt.u32.totalorder %s394_s18, %s514_s2 }
  0x26   :  { %p400_p4 = pnand %p398_p3, %p395_p2 }
  0x28   :  { %403 = shalt.err (!%p400_p4)
}
  0x29   :  { %s404_s23 = scalar_lea.vmem %s39_s6, 1024  ;;  %p409_p6 = scmp.lt.s32.totalorder %s39_s6, %s39_s6 }
  0x2a   :  { %p405_p5 = scmp.ne.s32.totalorder %s39_s6, %s404_s23  ;;  %p410_p7 = scmp.lt.s32.totalorder %s404_s23, %s404_s23 }
  0x2c   :  { %p411_p8 = por %p410_p7, %p409_p6 }
  0x2e   :  { %p412_p9 = pnand %p411_p8, %p405_p5 }
  0x30   :  { %415 = shalt.err (!%p412_p9)
}
  0x31   :  { %44 = dma.hbm_to_vmem [thread:$0]  %s514_s2, 1024, %s39_s6, [#allocation5], %s421_s25, %s421_s25, %s422_s26  }
  0x32   :  { %416 = dma.done.wait [#allocation3], 128  }
  0x33   :  { %417 = vsyncadd [#allocation3], 4294967168 }
  0x34   :  { %418 = dma.done.wait [#allocation5], 1344  }
  0x35   :  { %419 = vsyncadd [#allocation5], 4294965952  ;;  %v425_v0 = vmov 0.0   ;;  %vm426_vm0 = vmmov 0   ;;  %v339_v1 = vld [vmem:[#allocation4] sm:$0xff]   ;;  %v340_v2 = vld [vmem:[#allocation4 + $0x8] sm:$0xff]  }
  0x36   :  { %302 = vmatprep.subr.bf16.mxu0 %v425_v0  ;;  %308 = vmatprep.mubr.msk.bf16.mxu0 %vm426_vm0, %v425_v0  ;;  %v341_v3 = vld [vmem:[#allocation4 + $0x10] ss:$0 sps:$4 sm:$0xff]   ;;  %v342_v4 = vld [vmem:[#allocation6] sm:$0xff]   ;;  %vm92_vm1 = vcmask 1043456   ;;  %v343_v5 = vld [vmem:[#allocation6 + $0x8] sm:$0xff]   ;;  %vm88_vm2 = vcmask 326656  }
  0x37   :  { %312 = vmatprep.subr.bf16.mxu1 %v425_v0  ;;  %328 = vmatprep.mubr.msk.bf16.mxu1 %vm426_vm0, %v425_v0  ;;  %v57_v6 = vld [vmem:[#allocation2] sm:$0xff]  ;;  %v94_v7 = vsel %vm92_vm1, %v341_v3, 0  ;;  %v344_v9 = vld [vmem:[#allocation6 + $0x10] sm:$0xff]   ;;  %v345_v10 = vld [vmem:[#allocation6 + $0x18] sm:$0xff]   ;;  %vm264_vm3 = vcmask 7168  }
  0x38   :  { %303 = vmatpush3.bf16.msra.mxu0 %v339_v1  ;;  %313 = vmatpush3.bf16.msra.mxu1 %v342_v4  ;;  %v63_v8 = vpack.c.bf16 %v57_v6, %v57_v6  ;;  %v346_v11 = vld [vmem:[#allocation6 + $0x20] sm:$0xff]   ;;  %v347_v12 = vld [vmem:[#allocation6 + $0x28] sm:$0xff]   ;;  %v348_v13 = vld [vmem:[#allocation6 + $0x30] sm:$0xff]  }
  0x39   :  { %304 = vmatprep.subr.bf16.mxu0 %v425_v0  ;;  %314 = vmatprep.subr.bf16.mxu1 %v425_v0  ;;  %v349_v14 = vld [vmem:[#allocation6 + $0x38] sm:$0xff]   ;;  %v288_v34 = vld [vmem:[%s515_s3 + $0x4] ss:$0 sm:$0xff] }
  0x3a   :  { %v272_v15 = vld [vmem:[%s515_s3] ss:$0 sm:$0xff]  ;;  %v277_v16 = vld [vmem:[%s515_s3 + $0x1] ss:$0 sm:$0xff]  ;;  %v278_v25 = vld [vmem:[%s515_s3 + $0x2] ss:$0 sm:$0xff] }
  0x3b   :  { %v287_v30 = vld [vmem:[%s515_s3 + $0x3] ss:$0 sm:$0xff] }
  0x3c   :  { %305 = vmatpush3.bf16.msra.mxu0 %v340_v2  ;;  %315 = vmatpush3.bf16.msra.mxu1 %v343_v5 }
  0x3d   :  { %306 = vmatprep.subr.bf16.mxu0 %v425_v0  ;;  %316 = vmatprep.subr.bf16.mxu1 %v425_v0 }
  0x40   :  { %307 = vmatpush3.bf16.msra.mxu0 %v94_v7  ;;  %317 = vmatpush3.bf16.msra.mxu1 %v344_v9 }
  0x41   :  { %318 = vmatprep.subr.bf16.mxu1 %v425_v0 }
  0x43   :  { %309 = vmatmul.mubr.msk.bf16.vlgmr.msra.gmra.mrb[0].mxu0 %vm88_vm2, %v63_v8 }
  0x44   :  { %319 = vmatpush3.bf16.msra.mxu1 %v345_v10 }
  0x45   :  { %320 = vmatprep.subr.bf16.mxu1 %v425_v0 }
  0x48   :  { %321 = vmatpush3.bf16.msra.mxu1 %v346_v11 }
  0x49   :  { %322 = vmatprep.subr.bf16.mxu1 %v425_v0 }
  0x4c   :  { %323 = vmatpush3.bf16.msra.mxu1 %v347_v12 }
  0x4d   :  { %324 = vmatprep.subr.bf16.mxu1 %v425_v0 }
  0x50   :  { %325 = vmatpush3.bf16.msra.mxu1 %v348_v13 }
  0x51   :  { %326 = vmatprep.subr.bf16.mxu1 %v425_v0 }
  0x54   :  { %327 = vmatpush3.bf16.msra.mxu1 %v349_v14 }
 0x116   :  { %v130_v17 = vpop.f32.mrb[0].mxu0 }
 0x117   :  { %v131_v18 = vadd.f32 %v272_v15, %v130_v17  ;;  %v310_v19 = vpop.f32.mrb[1].mxu0 }
 0x118   :  { %v133_v20 = vpop.f32.mrb[2].mxu0 }
 0x119   :  { %v140_v21 = vmul.f32 %v277_v16, %v131_v18  ;;  %v311_v22 = vpop.f32.mrb[3].mxu0 }
 0x11b   :  { %v141_v23 = vmax.f32 %v131_v18, %v140_v21 }
 0x11d   :  { %v142_v24 = vpack.c.bf16 %v141_v23, %v141_v23 }
 0x11f   :  { %329 = vmatmul.mubr.bf16.vlgmr.msra.gmra.mrb[0].mxu1 %v142_v24 }
 0x1f2   :  { %v245_v26 = vpop.f32.mrb[0].mxu1 }
 0x1f3   :  { %v246_v27 = vadd.f32 %v278_v25, %v245_v26  ;;  %v330_v28 = vpop.f32.mrb[1].mxu1 }
 0x1f4   :  { %v248_v29 = vpop.f32.mrb[2].mxu1 }
 0x1f5   :  { %v251_v31 = vmax.f32 %v246_v27, 0.0  ;;  %v331_v32 = vpop.f32.mrb[3].mxu1 }
 0x1f7   :  { %v256_v33 = vmul.f32 %v287_v30, %v251_v31 }
 0x1f9   :  { %257 = vadd.xlane.f32.xlu0 %v256_v33 }
 0x286   :  { %v258_v35 = vpop.xlane.xlu0 %257 }
 0x287   :  { %v263_v36 = vadd.f32 %v288_v34, %v258_v35 }
 0x289   :  { %265 = vst.msk [vmem:[%s516_s4] sm:$0xff] %vm264_vm3, %v263_v36 }
 0x28a   :  { %270 = vsyncpa [#allocation3], 1 }
 0x28b   :  { %271 = vsyncpa [#allocation5], 1 }

</bundles_post_ra>
